<compile_context>
chip_gen: v6e
topology: v6e:2x2x1
jax: 0.10.0
libtpu: 0.0.40
codegen_flags: <defaults>
</compile_context>

<pallas_src>
import jax
import jax.numpy as jnp
from jax.experimental import pallas as pl
from jax.experimental.pallas import tpu as pltpu


def _round_up(x, m):
    return ((x + m - 1) // m) * m


# ----------------------------- Pallas kernel ------------------------------ #
def prompt_head_kernel(h_ref, w_ref, b_ref, mask3_ref, out_ref, m_ref, acc_ref):
    """h:[B,H] bf16 (resident), w:[H,TV] bf16, b:[1,TV] f32, mask3:[TV,3] f32.

    Scratch: m_ref [B,1] running max, acc_ref [B,3] running (neg, pos, denom).
    Output written only on the last vocab tile.
    """
    k = pl.program_id(0)

    @pl.when(k == 0)
    def _():
        m_ref[...] = jnp.full_like(m_ref, -1e30)
        acc_ref[...] = jnp.zeros_like(acc_ref)

    # Vocab-tile logits on the MXU (bf16 inputs, fp32 accumulation), bias folded in.
    logits = jnp.dot(h_ref[...], w_ref[...],
                     preferred_element_type=jnp.float32) + b_ref[...]        # [B, TV]

    # Online softmax update.
    m_old = m_ref[...]                                                       # [B, 1]
    m_new = jnp.maximum(m_old, jnp.max(logits, axis=-1, keepdims=True))      # [B, 1]
    rescale = jnp.exp(m_old - m_new)                                         # [B, 1]
    e = jnp.exp(logits - m_new)                                              # [B, TV] f32

    # One MXU matmul gives (neg, pos, denom) partial sums for this tile.
    partial = jnp.dot(e, mask3_ref[...], preferred_element_type=jnp.float32)  # [B, 3]

    acc_ref[...] = acc_ref[...] * rescale + partial
    m_ref[...] = m_new

    @pl.when(k == pl.num_programs(0) - 1)
    def _():
        acc = acc_ref[...]                                                   # [B, 3]
        inv_denom = pl.reciprocal(acc[:, 2:3], approx=False)                 # [B, 1]
        out_ref[...] = (acc[:, 0:2] * inv_denom).astype(out_ref.dtype)       # (neg, pos)


def prompt_head(h, w, b, mask3, *, tv=4096):
    """h:[B,H] f32, w:[H,V] f32, b:[1,V] f32, mask3:[V,3] f32 -> [B,2] f32."""
    B, H = h.shape
    V = w.shape[1]

    # Tile width: multiple of 128 lanes, no larger than the (rounded) vocab.
    tv = min(_round_up(tv, 128), _round_up(V, 128))
    v_pad = _round_up(V, tv)
    if v_pad != V:
        pad = v_pad - V
        w = jnp.pad(w, ((0, 0), (0, pad)))                       # zero columns
        b = jnp.pad(b, ((0, 0), (0, pad)), constant_values=-1e30)  # exp(.) ~ 0
        mask3 = jnp.pad(mask3, ((0, pad), (0, 0)))                # no label/denom hits

    # bf16 weight streaming; accumulation stays fp32 inside the kernel.
    h_bf = h.astype(jnp.bfloat16)
    w_bf = w.astype(jnp.bfloat16)
    b = b.astype(jnp.float32)
    mask3 = mask3.astype(jnp.float32)

    grid = (v_pad // tv,)

    cost = pl.CostEstimate(
        flops=2 * B * H * v_pad + 2 * B * v_pad * 3,
        transcendentals=B * v_pad,
        bytes_accessed=(H * v_pad * 2 + v_pad * 4 + v_pad * 3 * 4
                        + B * H * 2 + B * 2 * 4),
    )

    # Double-buffered streamed tiles (W bf16, b f32, mask3 f32) + resident h/out/scratch.
    vmem_est = 2 * (H * tv * 2 + tv * 4 + tv * 3 * 4) + B * H * 2 + (1 << 20)
    vmem_limit = int(min(max(2 * vmem_est, 32 * 1024 * 1024), 48 * 1024 * 1024))

    return pl.pallas_call(
        prompt_head_kernel,
        out_shape=jax.ShapeDtypeStruct((B, 2), jnp.float32),
        grid_spec=pltpu.PrefetchScalarGridSpec(
            num_scalar_prefetch=0,
            grid=grid,
            in_specs=[
                pl.BlockSpec((B, H), lambda k: (0, 0)),    # h: resident across V tiles
                pl.BlockSpec((H, tv), lambda k: (0, k)),   # W: streamed along V
                pl.BlockSpec((1, tv), lambda k: (0, k)),   # bias: streamed along V
                pl.BlockSpec((tv, 3), lambda k: (k, 0)),   # (neg, pos, ones) reduction matrix
            ],
            out_specs=pl.BlockSpec((B, 2), lambda k: (0, 0)),
            scratch_shapes=[
                pltpu.VMEM((B, 1), jnp.float32),   # running max
                pltpu.VMEM((B, 3), jnp.float32),   # running (neg, pos, denom)
            ],
        ),
        compiler_params=pltpu.CompilerParams(
            dimension_semantics=("arbitrary",),
            vmem_limit_bytes=vmem_limit,
        ),
        cost_estimate=cost,
    )(h_bf, w_bf, b, mask3)


# -------------------------- synthetic PLM (glue) --------------------------- #
class PromptModel:
    """JAX re-implementation of Prompt_Model with a synthetic deterministic PLM."""

    MASK_POS = 3

    def __init__(self, key, *, in_vocab, hidden, out_vocab,
                 p_label_idx, n_label_idx, tv=4096):
        k1, k2, k3, k4 = jax.random.split(key, 4)
        self.emb = jax.random.normal(k1, (in_vocab, hidden), jnp.float32) * 0.1
        self.type_emb = jax.random.normal(k2, (2, hidden), jnp.float32) * 0.1
        self.w_vocab = jax.random.normal(k3, (hidden, out_vocab), jnp.float32) * 0.1
        self.b_vocab = jax.random.normal(k4, (1, out_vocab), jnp.float32) * 0.1
        self.tv = tv
        self.p_label_idx = jnp.asarray(p_label_idx)
        self.n_label_idx = jnp.asarray(n_label_idx)
        # Fused reduction matrix: column 0 = neg multi-hot, 1 = pos multi-hot, 2 = ones
        # (ones column gives the softmax denominator in the same MXU matmul).
        mask3 = jnp.zeros((out_vocab, 3), jnp.float32)
        mask3 = mask3.at[self.n_label_idx, 0].set(1.0)
        mask3 = mask3.at[self.p_label_idx, 1].set(1.0)
        mask3 = mask3.at[:, 2].set(1.0)
        self.mask3 = mask3

    def _hidden_at_mask(self, input_id, attention_mask, token_type_id):
        # Synthetic PLM trunk (glue, plain JAX): embed + mask + type embedding.
        h_seq = self.emb[input_id]                                   # [B, S, H]
        h_seq = h_seq * attention_mask[..., None].astype(jnp.float32)
        h_seq = h_seq + self.type_emb[token_type_id]                 # [B, S, H]
        return h_seq[:, self.MASK_POS, :]                            # [B, H]

    def __call__(self, input_id, attention_mask, token_type_id):
        h = self._hidden_at_mask(input_id, attention_mask, token_type_id)
        return prompt_head(h, self.w_vocab, self.b_vocab, self.mask3, tv=self.tv)

    # Pure-JAX fp32 reference of the same forward (for verification only).
    def reference(self, input_id, attention_mask, token_type_id):
        h = self._hidden_at_mask(input_id, attention_mask, token_type_id)
        logits = h @ self.w_vocab + self.b_vocab                     # [B, V]
        probs = jax.nn.softmax(logits, axis=-1)
        pos = jnp.sum(probs[:, self.p_label_idx], axis=-1)
        neg = jnp.sum(probs[:, self.n_label_idx], axis=-1)
        return jnp.concatenate([neg[:, None], pos[:, None]], axis=-1)


# --------------------------------- main ------------------------------------ #
if __name__ == "__main__":
    B, S, H, V_IN, V_OUT = 8, 8, 128, 64, 512
    key = jax.random.PRNGKey(0)
    k_model, k_ids, k_type = jax.random.split(key, 3)

    # tv=128 at these toy sizes so the grid has 4 steps and the online-softmax
    # accumulation path is actually exercised.
    model = PromptModel(
        k_model,
        in_vocab=V_IN, hidden=H, out_vocab=V_OUT,
        p_label_idx=[5, 17], n_label_idx=[9, 42, 300],
        tv=128,
    )

    input_id = jax.random.randint(k_ids, (B, S), 0, V_IN, dtype=jnp.int32)
    attention_mask = jnp.ones((B, S), jnp.int32)
    token_type_id = jax.random.randint(k_type, (B, S), 0, 2, dtype=jnp.int32)

    out = model(input_id, attention_mask, token_type_id)
    out = jax.block_until_ready(out)

    ref = model.reference(input_id, attention_mask, token_type_id)
    assert out.shape == (B, 2) and out.dtype == jnp.float32
    # Kernel streams weights in bf16 (fp32 accumulation); compare against the
    # fp32 reference with a tolerance that covers bf16 weight rounding.
    assert jnp.allclose(out, ref, atol=2e-3, rtol=1e-2), (out, ref)

    print("KERNEL_OK")
</pallas_src>

<mosaic_0001>
module attributes {stable_mosaic.version = 11 : i64} {
  func.func @prompt_head_kernel(%arg0: i32, %arg1: memref<8x128xbf16, #tpu.memory_space<vmem>>, %arg2: memref<128x128xbf16, #tpu.memory_space<vmem>>, %arg3: memref<1x128xf32, #tpu.memory_space<vmem>>, %arg4: memref<128x3xf32, #tpu.memory_space<vmem>>, %arg5: memref<8x2xf32, #tpu.memory_space<vmem>>, %arg6: memref<8x1xf32, #tpu.memory_space<vmem>>, %arg7: memref<8x3xf32, #tpu.memory_space<vmem>>) attributes {dimension_semantics = [#tpu.dimension_semantics<arbitrary>], iteration_bounds = array<i64: 4>, scalar_prefetch = 0 : i64, scratch_operands = 2 : i64, tpu.core_type = #tpu.core_type<tc>, window_params = [{pipeline_mode = #tpu.pipeline_mode<synchronous>, transform_indices = @transform_0, window_bounds = array<i64: 8, 128>}, {transform_indices = @transform_1, window_bounds = array<i64: 128, 128>}, {transform_indices = @transform_2, window_bounds = array<i64: 1, 128>}, {transform_indices = @transform_3, window_bounds = array<i64: 128, 3>}, {pipeline_mode = #tpu.pipeline_mode<synchronous>, transform_indices = @transform_4, window_bounds = array<i64: 8, 2>}]} {
    %c0_i32 = arith.constant 0 : i32
    %0 = arith.cmpi eq, %arg0, %c0_i32 : i32
    %1 = arith.extui %0 : i1 to i32
    %c0_i32_0 = arith.constant 0 : i32
    %2 = arith.cmpi ne, %1, %c0_i32_0 : i32
    scf.if %2 {
      %cst_19 = arith.constant -1.000000e+30 : f32
      %29 = vector.broadcast %cst_19 : f32 to vector<8x1xf32>
      %c0_20 = arith.constant 0 : index
      %c0_21 = arith.constant 0 : index
      %30 = vector.load %arg6[%c0_20, %c0_21] : memref<8x1xf32, #tpu.memory_space<vmem>>, vector<8x1xf32>
      tpu.vector_store %arg6[%c0_20, %c0_21], %29 {strides = array<i32>} : memref<8x1xf32, #tpu.memory_space<vmem>>, vector<8x1xf32>,
      %cst_22 = arith.constant 0.000000e+00 : f32
      %31 = vector.broadcast %cst_22 : f32 to vector<8x3xf32>
      %c0_23 = arith.constant 0 : index
      %c0_24 = arith.constant 0 : index
      %32 = vector.load %arg7[%c0_23, %c0_24] : memref<8x3xf32, #tpu.memory_space<vmem>>, vector<8x3xf32>
      tpu.vector_store %arg7[%c0_23, %c0_24], %31 {strides = array<i32>} : memref<8x3xf32, #tpu.memory_space<vmem>>, vector<8x3xf32>,
    } else {
    }
    %c0 = arith.constant 0 : index
    %c0_1 = arith.constant 0 : index
    %3 = vector.load %arg1[%c0, %c0_1] : memref<8x128xbf16, #tpu.memory_space<vmem>>, vector<8x128xbf16>
    %c0_2 = arith.constant 0 : index
    %c0_3 = arith.constant 0 : index
    %4 = vector.load %arg2[%c0_2, %c0_3] : memref<128x128xbf16, #tpu.memory_space<vmem>>, vector<128x128xbf16>
    %cst = arith.constant dense<0.000000e+00> : vector<8x128xf32>
    %5 = tpu.matmul %3, %4, %cst {dimension_numbers = #tpu.dot_dimension_numbers<[1], [0], [0], [1], [0, 0, 1, 1], [], []>} : vector<8x128xbf16>, vector<128x128xbf16>, vector<8x128xf32> -> vector<8x128xf32>
    %c0_4 = arith.constant 0 : index
    %c0_5 = arith.constant 0 : index
    %6 = vector.load %arg3[%c0_4, %c0_5] : memref<1x128xf32, #tpu.memory_space<vmem>>, vector<1x128xf32>
    %7 = vector.broadcast %6 : vector<1x128xf32> to vector<8x128xf32>
    %8 = arith.addf %5, %7 : vector<8x128xf32>
    %c0_6 = arith.constant 0 : index
    %c0_7 = arith.constant 0 : index
    %9 = vector.load %arg6[%c0_6, %c0_7] : memref<8x1xf32, #tpu.memory_space<vmem>>, vector<8x1xf32>
    %cst_8 = arith.constant dense<0xFF800000> : vector<8xf32>
    %10 = vector.multi_reduction <maximumf>, %8, %cst_8 [1] : vector<8x128xf32> to vector<8xf32>
    %11 = vector.shape_cast %10 : vector<8xf32> to vector<8x1xf32>
    %12 = arith.maximumf %9, %11 : vector<8x1xf32>
    %13 = arith.subf %9, %12 : vector<8x1xf32>
    %14 = math.exp %13 : vector<8x1xf32>
    %15 = vector.broadcast %12 : vector<8x1xf32> to vector<8x128xf32>
    %16 = arith.subf %8, %15 : vector<8x128xf32>
    %17 = math.exp %16 : vector<8x128xf32>
    %c0_9 = arith.constant 0 : index
    %c0_10 = arith.constant 0 : index
    %18 = vector.load %arg4[%c0_9, %c0_10] : memref<128x3xf32, #tpu.memory_space<vmem>>, vector<128x3xf32>
    %cst_11 = arith.constant dense<0.000000e+00> : vector<8x3xf32>
    %19 = tpu.matmul %17, %18, %cst_11 {dimension_numbers = #tpu.dot_dimension_numbers<[1], [0], [0], [1], [0, 0, 1, 1], [], []>} : vector<8x128xf32>, vector<128x3xf32>, vector<8x3xf32> -> vector<8x3xf32>
    %c0_12 = arith.constant 0 : index
    %c0_13 = arith.constant 0 : index
    %20 = vector.load %arg7[%c0_12, %c0_13] : memref<8x3xf32, #tpu.memory_space<vmem>>, vector<8x3xf32>
    %21 = vector.broadcast %14 : vector<8x1xf32> to vector<8x3xf32>
    %22 = arith.mulf %20, %21 : vector<8x3xf32>
    %23 = arith.addf %22, %19 : vector<8x3xf32>
    %c0_14 = arith.constant 0 : index
    %c0_15 = arith.constant 0 : index
    %24 = vector.load %arg7[%c0_14, %c0_15] : memref<8x3xf32, #tpu.memory_space<vmem>>, vector<8x3xf32>
    tpu.vector_store %arg7[%c0_14, %c0_15], %23 {strides = array<i32>} : memref<8x3xf32, #tpu.memory_space<vmem>>, vector<8x3xf32>,
    %c0_16 = arith.constant 0 : index
    %c0_17 = arith.constant 0 : index
    %25 = vector.load %arg6[%c0_16, %c0_17] : memref<8x1xf32, #tpu.memory_space<vmem>>, vector<8x1xf32>
    tpu.vector_store %arg6[%c0_16, %c0_17], %12 {strides = array<i32>} : memref<8x1xf32, #tpu.memory_space<vmem>>, vector<8x1xf32>,
    %c3_i32 = arith.constant 3 : i32
    %26 = arith.cmpi eq, %arg0, %c3_i32 : i32
    %27 = arith.extui %26 : i1 to i32
    %c0_i32_18 = arith.constant 0 : i32
    %28 = arith.cmpi ne, %27, %c0_i32_18 : i32
    scf.if %28 {
      %c0_19 = arith.constant 0 : index
      %c0_20 = arith.constant 0 : index
      %29 = vector.load %arg7[%c0_19, %c0_20] : memref<8x3xf32, #tpu.memory_space<vmem>>, vector<8x3xf32>
      %30 = vector.extract_strided_slice %29 {offsets = [0, 2], sizes = [8, 1], strides = [1, 1]} : vector<8x3xf32> to vector<8x1xf32>
      %31 = tpu.reciprocal %30 : vector<8x1xf32> -> vector<8x1xf32>
      %32 = vector.extract_strided_slice %29 {offsets = [0, 0], sizes = [8, 2], strides = [1, 1]} : vector<8x3xf32> to vector<8x2xf32>
      %33 = vector.broadcast %31 : vector<8x1xf32> to vector<8x2xf32>
      %34 = arith.mulf %32, %33 : vector<8x2xf32>
      %c0_21 = arith.constant 0 : index
      %c0_22 = arith.constant 0 : index
      %35 = vector.load %arg5[%c0_21, %c0_22] : memref<8x2xf32, #tpu.memory_space<vmem>>, vector<8x2xf32>
      tpu.vector_store %arg5[%c0_21, %c0_22], %34 {strides = array<i32>} : memref<8x2xf32, #tpu.memory_space<vmem>>, vector<8x2xf32>,
    } else {
    }
    return
  }
  func.func @transform_0(%arg0: i32) -> (i32, i32) {
    %c0_i32 = arith.constant 0 : i32
    %c0_i32_0 = arith.constant 0 : i32
    %c0_i32_1 = arith.constant 0 : i32
    return %c0_i32, %c0_i32_0 : i32, i32
  }
  func.func @transform_1(%arg0: i32) -> (i32, i32) {
    %c0_i32 = arith.constant 0 : i32
    %c0_i32_0 = arith.constant 0 : i32
    return %c0_i32, %arg0 : i32, i32
  }
  func.func @transform_2(%arg0: i32) -> (i32, i32) {
    %c0_i32 = arith.constant 0 : i32
    %c0_i32_0 = arith.constant 0 : i32
    return %c0_i32, %arg0 : i32, i32
  }
  func.func @transform_3(%arg0: i32) -> (i32, i32) {
    %c0_i32 = arith.constant 0 : i32
    %c0_i32_0 = arith.constant 0 : i32
    return %arg0, %c0_i32 : i32, i32
  }
  func.func @transform_4(%arg0: i32) -> (i32, i32) {
    %c0_i32 = arith.constant 0 : i32
    %c0_i32_0 = arith.constant 0 : i32
    %c0_i32_1 = arith.constant 0 : i32
    return %c0_i32, %c0_i32_0 : i32, i32
  }
}

</mosaic_0001>

<bundles_post_ra>
// kernel: tpu_custom_call.1
= control target key start
LH: loop header
LB: loop body
LE: loop exit
PB: predicated region body
PF: predicated region fallthrough
CT: control target
= control target key end

     0   :  { %s830_s15 = smov 0   ;;  %s832_s16 = smov 0   ;;  %s980_s0 = inlined_call_operand.vmem [shape: bf16[8,128], index: 0, kind: input, shape index: {}]   ;;  %s981_s1 = inlined_call_operand.vmem [shape: bf16[128,512], index: 1, kind: input, shape index: {}]   ;;  %s982_s2 = inlined_call_operand.vmem [shape: f32[1,512], index: 2, kind: input, shape index: {}]   ;;  %s983_s3 = inlined_call_operand.vmem [shape: f32[512,3], index: 3, kind: input, shape index: {}]   ;;  %s984_s4 = inlined_call_operand.vmem [shape: f32[8,2], index: 4, kind: output, shape index: {}]  }
   0x1   :  { %s834_s17 = smov 0  }
   0x2 LB: > { %s846_s18 = sadd.s32 4294967295, %s797_s17   ;;  %s849_s19 = sadd.s32 1, %s797_s17   ;;  %s797_s17 = sphi %s834_s17, %s987_s17   ;;  %s793_s16 = sphi %s832_s16, %s986_s16   ;;  %s789_s15 = sphi %s830_s15, %s985_s15  }
   0x3   : > { %s39_s20 = ssub.s32 %s797_s17, %s849_s19  ;;  %s42_s21 = sadd.s32 1, %s793_s16 }
   0x4   : > { %p40_p0 = scmp.eq.s32.totalorder %s39_s20, 0  ;;  %p49_p1 = scmp.ne.s32.totalorder %s793_s16, %s789_s15 }
   0x5   : > { %p50_p2 = scmp.eq.s32.totalorder %s797_s17, 0  ;;  %p627_p4 = scmp.ge.s32.totalorder %s797_s17, 4 }
   0x6   : > { %s858_s22 = scalar_select %p40_p0, %s793_s16, %s42_s21  }
   0x7   : > { %p51_p3 = por %p50_p2, %p49_p1  ;;  %151 = sbr.rel (%p627_p4) target bundleno = 27 (0x1b), region = 20 }
   0xc   : > { %154 = sbr.rel (!%p51_p3) target bundleno = 27 (0x1b), region = 24  ;;  %s156_s23 = sand.u32 (%p51_p3), 1, %s793_s16  }
   0xd   : > { %s629_s24 = sshll.u32 (%p51_p3), %s797_s17, 2  ;;  %s628_s25 = sshll.u32 (%p51_p3), %s156_s23, 6 }
   0xe   : > { %s866_s28 = scalar_lea.vmem (%p51_p3), %s981_s1, %s629_s24  ;;  %s158_s29 = scalar_lea.vmem (%p51_p3), [#allocation4], %s628_s25 }
   0xf   : > { %v177_v0 = vld [vmem:[%s866_s28] sm:$0xf] (%p51_p3)  ;;  %v179_v1 = vld [vmem:[%s866_s28 + $0x10] sm:$0xf] (%p51_p3) }
  0x10   : > { %178 = vst [vmem:[%s158_s29] sm:$0xf] (%p51_p3), %v177_v0  ;;  %180 = vst [vmem:[%s158_s29 + $0x4] sm:$0xf] (%p51_p3), %v179_v1  ;;  %v181_v2 = vld [vmem:[%s866_s28 + $0x20] sm:$0xf] (%p51_p3) }
  0x11   : > { %v183_v3 = vld [vmem:[%s866_s28 + $0x30] sm:$0xf]  ;;  %v185_v4 = vld [vmem:[%s866_s28 + $0x40] sm:$0xf]  ;;  %182 = vst [vmem:[%s158_s29 + $0x8] sm:$0xf] %v181_v2 }
  0x12   : > { %184 = vst [vmem:[%s158_s29 + $0xc] sm:$0xf] %v183_v3  ;;  %186 = vst [vmem:[%s158_s29 + $0x10] sm:$0xf] %v185_v4  ;;  %v187_v5 = vld [vmem:[%s866_s28 + $0x50] sm:$0xf] }
  0x13   : > { %v189_v6 = vld [vmem:[%s866_s28 + $0x60] sm:$0xf]  ;;  %v191_v7 = vld [vmem:[%s866_s28 + $0x70] sm:$0xf]  ;;  %188 = vst [vmem:[%s158_s29 + $0x14] sm:$0xf] %v187_v5 }
  0x14   : > { %190 = vst [vmem:[%s158_s29 + $0x18] sm:$0xf] %v189_v6  ;;  %192 = vst [vmem:[%s158_s29 + $0x1c] sm:$0xf] %v191_v7  ;;  %v193_v8 = vld [vmem:[%s866_s28 + $0x80] sm:$0xf] }
  0x15   : > { %v195_v9 = vld [vmem:[%s866_s28 + $0x90] sm:$0xf]  ;;  %v197_v10 = vld [vmem:[%s866_s28 + $0xa0] sm:$0xf]  ;;  %194 = vst [vmem:[%s158_s29 + $0x20] sm:$0xf] %v193_v8 }
  0x16   : > { %196 = vst [vmem:[%s158_s29 + $0x24] sm:$0xf] %v195_v9  ;;  %198 = vst [vmem:[%s158_s29 + $0x28] sm:$0xf] %v197_v10  ;;  %v199_v11 = vld [vmem:[%s866_s28 + $0xb0] sm:$0xf] }
  0x17   : > { %v201_v12 = vld [vmem:[%s866_s28 + $0xc0] sm:$0xf]  ;;  %v203_v13 = vld [vmem:[%s866_s28 + $0xd0] sm:$0xf]  ;;  %200 = vst [vmem:[%s158_s29 + $0x2c] sm:$0xf] %v199_v11 }
  0x18   : > { %202 = vst [vmem:[%s158_s29 + $0x30] sm:$0xf] %v201_v12  ;;  %204 = vst [vmem:[%s158_s29 + $0x34] sm:$0xf] %v203_v13  ;;  %v205_v14 = vld [vmem:[%s866_s28 + $0xe0] sm:$0xf] }
  0x19   : > { %v207_v15 = vld [vmem:[%s866_s28 + $0xf0] sm:$0xf]  ;;  %206 = vst [vmem:[%s158_s29 + $0x38] sm:$0xf] %v205_v14 }
  0x1a   : > { %208 = vst [vmem:[%s158_s29 + $0x3c] sm:$0xf] %v207_v15 }
  0x1b PF: > { %p630_p5 = scmp.ge.s32.totalorder %s797_s17, 1  ;;  %p278_p6 = scmp.lt.s32.totalorder %s797_s17, 5 }
  0x1d   : > { %p279_p7 = pnand %p630_p5, %p278_p6 }
  0x1e   : > { %s285_s30 = sand.u32 (!%p279_p7), 1, %s789_s15   ;;  %p313_p8 = scmp.lt.s32.totalorder (!%p279_p7), %s846_s18, 3 }
  0x1f   : > { %282 = sbr.rel (%p279_p7) target bundleno = 899 (0x383), region = 73  ;;  %s631_s5 = sshll.u32 (!%p279_p7), %s285_s30, 6 }
  0x20   : > { %s632_s6 = sshll.u32 (!%p279_p7), %s846_s18, 4  ;;  %s901_s17 = scalar_lea.vmem (!%p279_p7), [#allocation4], %s631_s5 }
  0x21   : > { %p317_p9 = scmp.lt.s32.totalorder (!%p279_p7), %s632_s6, 63  ;;  %p634_p10 = scmp.ne.s32.totalorder (!%p279_p7), %s846_s18, 0 }
  0x24   : > { %s890_s7 = scalar_select %p313_p8, %s846_s18, 3 }
  0x25   : > { %s989_s6 = smov (!%p317_p9, %s632_s6), 63  ;;  %326 = sbr.rel (%p634_p10) target bundleno = 45 (0x2d), region = 81 }
  0x26   : > { %s315_s10 = scalar_lea.vmem %s982_s2, %s890_s7  ;;  %s633_s11 = sshll.u32 %s989_s6, 3 }
  0x27   : > { %s899_s14 = scalar_lea.vmem %s983_s3, %s633_s11 }
  0x2a   : > { %vm327_vm0 = vcmask 7168   ;;  %vm329_vm1 = vcmask 23552   ;;  %v799_v16 = vmov -1e+30   ;;  %v800_v17 = vmov 0.0  }
  0x2b   : > { %328 = vst.msk [vmem:[#allocation2] sm:$0xff] %vm327_vm0, %v799_v16 }
  0x2c   : > { %330 = vst.msk [vmem:[#allocation3] sm:$0xff] %vm329_vm1, %v800_v17 }
  0x2d PF: > { %v760_v18 = vld [vmem:[%s901_s17 + $0x38] sm:$0xff]   ;;  %v801_v19 = vmov 0.0   ;;  %v761_v20 = vld [vmem:[%s901_s17 + $0x30] sm:$0xff]   ;;  %vm802_vm2 = vmmov 0   ;;  %v762_v21 = vld [vmem:[%s901_s17 + $0x28] sm:$0xff]   ;;  %v803_v34 = vmov 0  }
  0x2e   : > { %673 = vmatprep.subr.bf16.mxu0 %v801_v19  ;;  %693 = vmatprep.subr.mxu1 %v801_v19  ;;  %v763_v22 = vld [vmem:[%s901_s17 + $0x20] sm:$0xff]   ;;  %v764_v23 = vld [vmem:[%s901_s17 + $0x18] sm:$0xff]   ;;  %v765_v24 = vld [vmem:[%s901_s17 + $0x10] sm:$0xff]   ;;  %vm554_vm3 = vcmask 7168   ;;  %vm552_vm4 = vcmask 23552   ;;  %p644_p11 = scmp.ne.s32.totalorder %s846_s18, 3 }
  0x2f   : > { %674 = vmatpush3.bf16.msra.mxu0 %v760_v18  ;;  %689 = vmatprep.mubr.msk.bf16.mxu0 %vm802_vm2, %v801_v19  ;;  %v766_v25 = vld [vmem:[%s901_s17 + $0x8] sm:$0xff]   ;;  %v767_v26 = vld [vmem:[%s901_s17] sm:$0xff]   ;;  %v331_v27 = vld [vmem:[%s980_s0] sm:$0xf] }
  0x30   : > { %675 = vmatprep.subr.bf16.mxu0 %v801_v19  ;;  %725 = vmatprep.mubr.msk.f32.mxu1 %vm802_vm2, %v801_v19  ;;  %v635_v28 = vld [vmem:[%s315_s10] ss:$0 sm:$0xff]  ;;  %v473_v35 = vld [vmem:[%s899_s14 + $0x78] sm:$0xff]  ;;  %v472_v36 = vld [vmem:[%s899_s14 + $0x70] sm:$0xff] }
  0x31   : > { %758 = vset.pattern.permute.xlu0 %v803_v34  ;;  %759 = vset.pattern.permute.xlu1 %v803_v34  ;;  %v471_v37 = vld [vmem:[%s899_s14 + $0x68] sm:$0xff]  ;;  %v470_v38 = vld [vmem:[%s899_s14 + $0x60] sm:$0xff]  ;;  %v469_v39 = vld [vmem:[%s899_s14 + $0x58] sm:$0xff] }
  0x32   : > { %694 = vmatpush3.msra.mxu1 %v473_v35  ;;  %v468_v40 = vld [vmem:[%s899_s14 + $0x50] sm:$0xff]  ;;  %v467_v41 = vld [vmem:[%s899_s14 + $0x48] sm:$0xff]  ;;  %v443_v42 = vld [vmem:[#allocation2] sm:$0xff] }
  0x33   : > { %676 = vmatpush3.bf16.msra.mxu0 %v761_v20  ;;  %695 = vmatprep.subr.mxu1 %v801_v19  ;;  %v466_v43 = vld [vmem:[%s899_s14 + $0x40] sm:$0xff]  ;;  %v465_v46 = vld [vmem:[%s899_s14 + $0x38] sm:$0xff]  ;;  %v464_v48 = vld [vmem:[%s899_s14 + $0x30] sm:$0xff] }
  0x34   : > { %677 = vmatprep.subr.bf16.mxu0 %v801_v19  ;;  %696 = vmatpush3.msra.mxu1 %v472_v36  ;;  %v463_v49 = vld [vmem:[%s899_s14 + $0x28] sm:$0xff]  ;;  %v462_v51 = vld [vmem:[%s899_s14 + $0x20] sm:$0xff]  ;;  %v461_v52 = vld [vmem:[%s899_s14 + $0x18] sm:$0xff] }
  0x35   : > { %697 = vmatprep.subr.mxu1 %v801_v19  ;;  %v460_v53 = vld [vmem:[%s899_s14 + $0x10] sm:$0xff]  ;;  %v459_v54 = vld [vmem:[%s899_s14 + $0x8] sm:$0xff]  ;;  %v458_v55 = vld [vmem:[%s899_s14] sm:$0xff] }
  0x36   : > { %698 = vmatpush3.msra.mxu1 %v471_v37  ;;  %v544_v61 = vld [vmem:[#allocation3] sm:$0xff] }
  0x37   : > { %678 = vmatpush3.bf16.msra.mxu0 %v762_v21  ;;  %699 = vmatprep.subr.mxu1 %v801_v19 }
  0x38   : > { %679 = vmatprep.subr.bf16.mxu0 %v801_v19  ;;  %700 = vmatpush3.msra.mxu1 %v470_v38 }
  0x39   : > { %701 = vmatprep.subr.mxu1 %v801_v19 }
  0x3a   : > { %702 = vmatpush3.msra.mxu1 %v469_v39 }
  0x3b   : > { %680 = vmatpush3.bf16.msra.mxu0 %v763_v22  ;;  %703 = vmatprep.subr.mxu1 %v801_v19 }
  0x3c   : > { %681 = vmatprep.subr.bf16.mxu0 %v801_v19  ;;  %704 = vmatpush3.msra.mxu1 %v468_v40 }
  0x3d   : > { %705 = vmatprep.subr.mxu1 %v801_v19 }
  0x3e   : > { %706 = vmatpush3.msra.mxu1 %v467_v41 }
  0x3f   : > { %682 = vmatpush3.bf16.msra.mxu0 %v764_v23  ;;  %707 = vmatprep.subr.mxu1 %v801_v19 }
  0x40   : > { %683 = vmatprep.subr.bf16.mxu0 %v801_v19  ;;  %708 = vmatpush3.msra.mxu1 %v466_v43 }
  0x41   : > { %709 = vmatprep.subr.mxu1 %v801_v19 }
  0x42   : > { %710 = vmatpush3.msra.mxu1 %v465_v46 }
  0x43   : > { %684 = vmatpush3.bf16.msra.mxu0 %v765_v24  ;;  %711 = vmatprep.subr.mxu1 %v801_v19 }
  0x44   : > { %685 = vmatprep.subr.bf16.mxu0 %v801_v19  ;;  %712 = vmatpush3.msra.mxu1 %v464_v48 }
  0x45   : > { %713 = vmatprep.subr.mxu1 %v801_v19 }
  0x46   : > { %714 = vmatpush3.msra.mxu1 %v463_v49 }
  0x47   : > { %686 = vmatpush3.bf16.msra.mxu0 %v766_v25  ;;  %715 = vmatprep.subr.mxu1 %v801_v19 }
  0x48   : > { %687 = vmatprep.subr.bf16.mxu0 %v801_v19  ;;  %716 = vmatpush3.msra.mxu1 %v462_v51 }
  0x49   : > { %717 = vmatprep.subr.mxu1 %v801_v19 }
  0x4a   : > { %718 = vmatpush3.msra.mxu1 %v461_v52 }
  0x4b   : > { %688 = vmatpush3.bf16.msra.mxu0 %v767_v26  ;;  %719 = vmatprep.subr.mxu1 %v801_v19 }
  0x4c   : > { %720 = vmatpush3.msra.mxu1 %v460_v53 }
  0x4d   : > { %721 = vmatprep.subr.mxu1 %v801_v19 }
  0x4e   : > { %690 = vmatmul.mubr.bf16.vlgmr.msra.gmra.mxu0 %v331_v27  ;;  %722 = vmatpush3.msra.mxu1 %v459_v54 }
  0x4f   : > { %723 = vmatprep.subr.mxu1 %v801_v19 }
  0x50   : > { %724 = vmatpush3.msra.mxu1 %v458_v55 }
 0x10e   : > { %v437_v29 = vpop.f32.mrf.mxu0 }
 0x10f   : > { %v931_v30 = vadd.f32 %v635_v28, %v437_v29 }
 0x110   : > { %v691_v31 = vpop.f32.mrf.mxu0 }
 0x111   : > { %444 = vmax.xlane.f32.xlu0 %v931_v30 }
 0x112   : > { %v440_v32 = vpop.f32.mrf.mxu0 }
 0x114   : > { %v692_v33 = vpop.f32.mrf.mxu0 }
 0x19a   : > { %v445_v44 = vpop.xlane.xlu0 %444 }
 0x19b   : > { %v446_v45 = vmax.f32 %v443_v42, %v445_v44 }
 0x19d   : > { %v447_v47 = vsub.f32 %v443_v42, %v446_v45  ;;  %555 = vst.msk [vmem:[#allocation2] sm:$0xff] %vm554_vm3, %v446_v45  ;;  %452 = vperm.xlu0 %758, %v446_v45  }
 0x19f   : > { %v448_v50 = vmul.f32 1.442695, %v447_v47 }
 0x1a1   : > { %768 = vpow2.f32 %v448_v50 }
 0x1ae   : > { %v769_v56 = vpop.eup %768 }
 0x1af   : > { %547 = vperm.xlu1 %759, %v769_v56  }
 0x218   : > { %v453_v57 = vpop.permute.xlu0 %452 }
 0x219   : > { %v455_v58 = vsub.f32 %v931_v30, %v453_v57 }
 0x21b   : > { %v456_v59 = vmul.f32 1.442695, %v455_v58 }
 0x21d   : > { %770 = vpow2.f32 %v456_v59 }
 0x22a   : > { %v771_v60 = vpop.eup %770  ;;  %v548_v62 = vpop.permute.xlu1 %547 }
 0x22b   : > { %726 = vmatmul.mubr.f32.vlgmr.msra.gmra.mxu1 %v771_v60  ;;  %v550_v63 = vmul.f32 %v548_v62, %v544_v61 }
 0x2ea   : > { %559 = sbr.rel (%p644_p11) target bundleno = 899 (0x383), region = 85 }
 0x2eb   : > { %v540_v0 = vpop.f32.mrf.mxu1 }
 0x2ec   : > { %v551_v1 = vadd.f32 %v550_v63, %v540_v0 }
 0x2ed   : > { %v727_v2 = vpop.f32.mrf.mxu1 }
 0x2ee   : > { %553 = vst.msk [vmem:[#allocation3] sm:$0xff] %vm552_vm4, %v551_v1 }
 0x2ef   : > { %v804_v4 = vmov 2   ;;  %vm568_vm5 = vcmask 15360  }
 0x2f0   : > { %772 = vset.pattern.permute.xlu0 %v804_v4 }
 0x2f5   : > { %v560_v3 = vld [vmem:[#allocation3] sm:$0xff] }
 0x2f6   : > { %773 = vrcp.f32 %v560_v3 }
 0x303   : > { %v774_v5 = vpop.eup %773 }
 0x304   : > { %564 = vperm.xlu0 %772, %v774_v5  }
 0x37f   : > { %v565_v6 = vpop.permute.xlu0 %564 }
 0x380   : > { %v567_v7 = vmul.f32 %v565_v6, %v560_v3 }
 0x382   : > { %569 = vst.msk [vmem:[%s984_s4] sm:$0xff] %vm568_vm5, %v567_v7 }
 0x383 PF: > { %p11_p12 = scmp.ge.s32.totalorder %s849_s19, 6   ;;  %s985_s15 = smov %s793_s16 }
 0x384   : > { %s986_s16 = smov %s858_s22  ;;  %s987_s17 = smov %s849_s19 }
 0x385   :  { %13 = sbr.rel (!%p11_p12) target bundleno = 2 (0x2), region = 122 }

</bundles_post_ra>
